<compile_context>
chip_gen: v6e
topology: v6e:2x2x1
jax: 0.10.0
libtpu: 0.0.40
codegen_flags: <defaults>
</compile_context>

<pallas_src>
import math

import jax
import jax.numpy as jnp
from jax.experimental import pallas as pl
from jax.experimental.pallas import tpu as pltpu


# ------------------------------ Pallas kernel -------------------------------

def _dct_block_kernel(x_ref, a_ref, bm_ref, o_ref, m_ref):
    # x_ref : (N*H, W)  all B*C*H image rows, flattened (N = B*C)
    # a_ref : (P, H)    A  = dh^T @ ch[:P, :]
    # bm_ref: (W, P)    Bm = cw[:P, :]^T @ dw
    # o_ref : (P, N*P)  lane-dense output slab
    # m_ref : (H, N*P)  VMEM scratch holding the regrouped first-stage result
    P, H = a_ref.shape
    N = o_ref.shape[1] // P

    # Matmul 1: width contraction for all B*C*H rows at once (one big MXU op).
    t1 = jnp.dot(x_ref[...], bm_ref[...],
                 preferred_element_type=jnp.float32)          # (N*H, P)

    # Regroup (N, H, P) -> (H, N*P): N static sub-tile copies (pure VMEM data
    # movement; N = B*C is small & static so the loop is unrolled at trace time).
    for n in range(N):
        m_ref[:, n * P:(n + 1) * P] = t1[n * H:(n + 1) * H, :]

    # Matmul 2: height contraction for all channels at once -> lane-dense slab.
    o_ref[...] = jnp.dot(a_ref[...], m_ref[...],
                         preferred_element_type=jnp.float32).astype(o_ref.dtype)


# ------------------------------ host wrapper --------------------------------

def dct_block_direct_forward(x, params):
    """x: (B, C, H, W) NCHW; params hold the (learnable) DCT-II basis matrices."""
    B, C, H, W = x.shape
    ch, cw = params["dct_h"], params["dct_w"]      # (H, H), (W, W)
    dh, dw = params["idct_h"], params["idct_w"]    # (P, P), (P, P)
    P = dh.shape[0]
    assert ch.shape == (H, H) and cw.shape == (W, W)
    assert dh.shape == (P, P) and dw.shape == (P, P)
    N = B * C

    # Batch-independent folded operators (DCT -> crop -> iDCT per axis), computed
    # once outside the kernel. (Do NOT init these in-kernel under pl.when: that
    # would break under a 'parallel' megacore split if a grid is later added.)
    A = jnp.dot(dh.T, ch[:P, :]).astype(jnp.float32)    # (P, H)
    Bm = jnp.dot(cw[:P, :].T, dw).astype(jnp.float32)   # (W, P)

    x2d = x.reshape(N * H, W)   # contiguous reshape: free

    slab = pl.pallas_call(
        _dct_block_kernel,
        out_shape=jax.ShapeDtypeStruct((P, N * P), x.dtype),
        scratch_shapes=[pltpu.VMEM((H, N * P), jnp.float32)],
    )(x2d, A, Bm)

    # (P, N*P) -> (B, C, P, P): tiny layout plumbing outside the kernel.
    return jnp.transpose(slab.reshape(P, N, P), (1, 0, 2)).reshape(B, C, P, P)


# --------------------------- basis + JAX reference --------------------------

def dct_ii_matrix(n):
    """Orthonormal DCT-II basis: M[k, i] = s_k * cos(pi*(2i+1)*k / (2n))."""
    k = jnp.arange(n, dtype=jnp.float32)[:, None]
    i = jnp.arange(n, dtype=jnp.float32)[None, :]
    m = jnp.cos(math.pi * (2.0 * i + 1.0) * k / (2.0 * n)) * math.sqrt(2.0 / n)
    return m.at[0, :].multiply(1.0 / math.sqrt(2.0))


def _reference(x, params):
    """Pure-JAX reference with the unfolded module semantics (DCT -> crop -> iDCT)."""
    ch, cw = params["dct_h"], params["dct_w"]
    dh, dw = params["idct_h"], params["idct_w"]
    P = dh.shape[0]
    y = jnp.einsum("uh,bchw,vw->bcuv", ch, x, cw)     # DctII2d
    y = y[:, :, :P, :P]                               # Dct2dPooling
    return jnp.einsum("hu,bchw,wv->bcuv", dh, y, dw)  # iDctII2d


# ----------------------------------- main ------------------------------------

if __name__ == "__main__":
    # DctBlockDirect(width=24, height=24): crop/iDCT size P = width // 3 = 8.
    width = height = 24
    P = width // 3
    B, C = 2, 4

    key = jax.random.PRNGKey(0)
    x = jax.random.normal(key, (B, C, height, width), jnp.float32)

    params = {
        "dct_h": dct_ii_matrix(height),   # DctII2d height basis
        "dct_w": dct_ii_matrix(width),    # DctII2d width basis
        "idct_h": dct_ii_matrix(P),       # iDctII2d height basis
        "idct_w": dct_ii_matrix(P),       # iDctII2d width basis
    }

    out = dct_block_direct_forward(x, params)
    out = jax.block_until_ready(out)

    ref = _reference(x, params)
    assert out.shape == (B, C, P, P), out.shape
    assert jnp.isfinite(out).all()
    err = float(jnp.max(jnp.abs(out - ref)))
    assert jnp.allclose(out, ref, atol=1e-3, rtol=1e-3), err
    print("KERNEL_OK")
</pallas_src>

<mosaic_0001>
module attributes {stable_mosaic.version = 11 : i64} {
  func.func @_dct_block_kernel(%arg0: memref<192x24xf32, #tpu.memory_space<vmem>>, %arg1: memref<8x24xf32, #tpu.memory_space<vmem>>, %arg2: memref<24x8xf32, #tpu.memory_space<vmem>>, %arg3: memref<8x64xf32, #tpu.memory_space<vmem>>, %arg4: memref<24x64xf32, #tpu.memory_space<vmem>>) attributes {dimension_semantics = [], scalar_prefetch = 0 : i64, scratch_operands = 1 : i64, tpu.core_type = #tpu.core_type<tc>} {
    %c0 = arith.constant 0 : index
    %c0_0 = arith.constant 0 : index
    %0 = vector.load %arg0[%c0, %c0_0] : memref<192x24xf32, #tpu.memory_space<vmem>>, vector<192x24xf32>
    %c0_1 = arith.constant 0 : index
    %c0_2 = arith.constant 0 : index
    %1 = vector.load %arg2[%c0_1, %c0_2] : memref<24x8xf32, #tpu.memory_space<vmem>>, vector<24x8xf32>
    %cst = arith.constant dense<0.000000e+00> : vector<192x8xf32>
    %2 = tpu.matmul %0, %1, %cst {dimension_numbers = #tpu.dot_dimension_numbers<[1], [0], [0], [1], [0, 0, 1, 1], [], []>} : vector<192x24xf32>, vector<24x8xf32>, vector<192x8xf32> -> vector<192x8xf32>
    %3 = vector.extract_strided_slice %2 {offsets = [0, 0], sizes = [24, 8], strides = [1, 1]} : vector<192x8xf32> to vector<24x8xf32>
    %c0_3 = arith.constant 0 : index
    %c0_4 = arith.constant 0 : index
    %4 = vector.load %arg4[%c0_3, %c0_4] : memref<24x64xf32, #tpu.memory_space<vmem>>, vector<24x8xf32>
    tpu.vector_store %arg4[%c0_3, %c0_4], %3 {strides = array<i32>} : memref<24x64xf32, #tpu.memory_space<vmem>>, vector<24x8xf32>,
    %5 = vector.extract_strided_slice %2 {offsets = [24, 0], sizes = [24, 8], strides = [1, 1]} : vector<192x8xf32> to vector<24x8xf32>
    %c0_5 = arith.constant 0 : index
    %c8 = arith.constant 8 : index
    %6 = vector.load %arg4[%c0_5, %c8] : memref<24x64xf32, #tpu.memory_space<vmem>>, vector<24x8xf32>
    tpu.vector_store %arg4[%c0_5, %c8], %5 {strides = array<i32>} : memref<24x64xf32, #tpu.memory_space<vmem>>, vector<24x8xf32>,
    %7 = vector.extract_strided_slice %2 {offsets = [48, 0], sizes = [24, 8], strides = [1, 1]} : vector<192x8xf32> to vector<24x8xf32>
    %c0_6 = arith.constant 0 : index
    %c16 = arith.constant 16 : index
    %8 = vector.load %arg4[%c0_6, %c16] : memref<24x64xf32, #tpu.memory_space<vmem>>, vector<24x8xf32>
    tpu.vector_store %arg4[%c0_6, %c16], %7 {strides = array<i32>} : memref<24x64xf32, #tpu.memory_space<vmem>>, vector<24x8xf32>,
    %9 = vector.extract_strided_slice %2 {offsets = [72, 0], sizes = [24, 8], strides = [1, 1]} : vector<192x8xf32> to vector<24x8xf32>
    %c0_7 = arith.constant 0 : index
    %c24 = arith.constant 24 : index
    %10 = vector.load %arg4[%c0_7, %c24] : memref<24x64xf32, #tpu.memory_space<vmem>>, vector<24x8xf32>
    tpu.vector_store %arg4[%c0_7, %c24], %9 {strides = array<i32>} : memref<24x64xf32, #tpu.memory_space<vmem>>, vector<24x8xf32>,
    %11 = vector.extract_strided_slice %2 {offsets = [96, 0], sizes = [24, 8], strides = [1, 1]} : vector<192x8xf32> to vector<24x8xf32>
    %c0_8 = arith.constant 0 : index
    %c32 = arith.constant 32 : index
    %12 = vector.load %arg4[%c0_8, %c32] : memref<24x64xf32, #tpu.memory_space<vmem>>, vector<24x8xf32>
    tpu.vector_store %arg4[%c0_8, %c32], %11 {strides = array<i32>} : memref<24x64xf32, #tpu.memory_space<vmem>>, vector<24x8xf32>,
    %13 = vector.extract_strided_slice %2 {offsets = [120, 0], sizes = [24, 8], strides = [1, 1]} : vector<192x8xf32> to vector<24x8xf32>
    %c0_9 = arith.constant 0 : index
    %c40 = arith.constant 40 : index
    %14 = vector.load %arg4[%c0_9, %c40] : memref<24x64xf32, #tpu.memory_space<vmem>>, vector<24x8xf32>
    tpu.vector_store %arg4[%c0_9, %c40], %13 {strides = array<i32>} : memref<24x64xf32, #tpu.memory_space<vmem>>, vector<24x8xf32>,
    %15 = vector.extract_strided_slice %2 {offsets = [144, 0], sizes = [24, 8], strides = [1, 1]} : vector<192x8xf32> to vector<24x8xf32>
    %c0_10 = arith.constant 0 : index
    %c48 = arith.constant 48 : index
    %16 = vector.load %arg4[%c0_10, %c48] : memref<24x64xf32, #tpu.memory_space<vmem>>, vector<24x8xf32>
    tpu.vector_store %arg4[%c0_10, %c48], %15 {strides = array<i32>} : memref<24x64xf32, #tpu.memory_space<vmem>>, vector<24x8xf32>,
    %17 = vector.extract_strided_slice %2 {offsets = [168, 0], sizes = [24, 8], strides = [1, 1]} : vector<192x8xf32> to vector<24x8xf32>
    %c0_11 = arith.constant 0 : index
    %c56 = arith.constant 56 : index
    %18 = vector.load %arg4[%c0_11, %c56] : memref<24x64xf32, #tpu.memory_space<vmem>>, vector<24x8xf32>
    tpu.vector_store %arg4[%c0_11, %c56], %17 {strides = array<i32>} : memref<24x64xf32, #tpu.memory_space<vmem>>, vector<24x8xf32>,
    %c0_12 = arith.constant 0 : index
    %c0_13 = arith.constant 0 : index
    %19 = vector.load %arg1[%c0_12, %c0_13] : memref<8x24xf32, #tpu.memory_space<vmem>>, vector<8x24xf32>
    %c0_14 = arith.constant 0 : index
    %c0_15 = arith.constant 0 : index
    %20 = vector.load %arg4[%c0_14, %c0_15] : memref<24x64xf32, #tpu.memory_space<vmem>>, vector<24x64xf32>
    %cst_16 = arith.constant dense<0.000000e+00> : vector<8x64xf32>
    %21 = tpu.matmul %19, %20, %cst_16 {dimension_numbers = #tpu.dot_dimension_numbers<[1], [0], [0], [1], [0, 0, 1, 1], [], []>} : vector<8x24xf32>, vector<24x64xf32>, vector<8x64xf32> -> vector<8x64xf32>
    %c0_17 = arith.constant 0 : index
    %c0_18 = arith.constant 0 : index
    %22 = vector.load %arg3[%c0_17, %c0_18] : memref<8x64xf32, #tpu.memory_space<vmem>>, vector<8x64xf32>
    tpu.vector_store %arg3[%c0_17, %c0_18], %21 {strides = array<i32>} : memref<8x64xf32, #tpu.memory_space<vmem>>, vector<8x64xf32>,
    return
  }
}

</mosaic_0001>

<bundles_post_ra>
// kernel: tpu_custom_call.1
= control target key start
LH: loop header
LB: loop body
LE: loop exit
PB: predicated region body
PF: predicated region fallthrough
CT: control target
= control target key end

     0   :  { %vm42_vm0 = vcmask 195584   ;;  %s812_s0 = inlined_call_operand.vmem [shape: f32[192,24], index: 0, kind: input, shape index: {}]   ;;  %s813_s1 = inlined_call_operand.vmem [shape: f32[8,24], index: 1, kind: input, shape index: {}]   ;;  %s814_s2 = inlined_call_operand.vmem [shape: f32[24,8], index: 2, kind: input, shape index: {}]   ;;  %s815_s3 = inlined_call_operand.hbm [shape: f32[8,64], index: 3, kind: output, shape index: {}]  }
   0x1   :  { %v41_v0 = vld [vmem:[%s814_s2 + $0x10] sm:$0xff]  ;;  %v40_v1 = vld [vmem:[%s814_s2 + $0x8] sm:$0xff]  ;;  %v39_v2 = vld [vmem:[%s814_s2] sm:$0xff] }
   0x2   :  { %565 = vmatprep.subr.mxu0 %v41_v0  ;;  %616 = vmatprep.subr.mxu1 %v41_v0  ;;  %v15_v3 = vld [vmem:[%s812_s0] sm:$0xff]  ;;  %v29_v4 = vld [vmem:[%s812_s0 + $0x70] sm:$0xff]  ;;  %v16_v5 = vld [vmem:[%s812_s0 + $0x8] sm:$0xff] }
   0x3   :  { %566 = vmatpush3.msra.mxu0 %v41_v0  ;;  %619 = vmatpush3.msra.mxu1 %v41_v0  ;;  %v30_v6 = vld [vmem:[%s812_s0 + $0x78] sm:$0xff]  ;;  %v17_v7 = vld [vmem:[%s812_s0 + $0x10] sm:$0xff]  ;;  %v31_v8 = vld [vmem:[%s812_s0 + $0x80] sm:$0xff] }
   0x4   :  { %567 = vmatprep.subr.mxu0 %v40_v1  ;;  %617 = vmatprep.subr.mxu1 %v40_v1  ;;  %v18_v9 = vld [vmem:[%s812_s0 + $0x18] sm:$0xff]  ;;  %v32_v10 = vld [vmem:[%s812_s0 + $0x88] sm:$0xff] }
   0x5   :  { %568 = vmatpush3.msra.mxu0 %v40_v1  ;;  %620 = vmatpush3.msra.mxu1 %v40_v1 }
   0x6   :  { %569 = vmatprep.subr.mxu0 %v39_v2  ;;  %618 = vmatprep.subr.mxu1 %v39_v2 }
   0x7   :  { %570 = vmatpush3.msra.mxu0 %v39_v2  ;;  %621 = vmatpush3.msra.mxu1 %v39_v2 }
   0x8   :  { %571 = vmatprep.mubr.msk.f32.mxu0 %vm42_vm0, %v15_v3  ;;  %592 = vmatprep.mubr.msk.f32.mxu1 %vm42_vm0, %v29_v4 }
   0x9   :  { %572 = vmatmul.mubr.msk.f32.vlgmr.msra.gmra.mxu0 %vm42_vm0, %v16_v5  ;;  %593 = vmatmul.mubr.msk.f32.vlgmr.msra.gmra.mxu1 %vm42_vm0, %v30_v6 }
   0xa   :  { %574 = vmatprep.mubr.msk.f32.mxu0 %vm42_vm0, %v17_v7  ;;  %595 = vmatprep.mubr.msk.f32.mxu1 %vm42_vm0, %v31_v8 }
   0xb   :  { %8 = vsyncpa [#allocation4], 0  ;;  %v19_v11 = vld [vmem:[%s812_s0 + $0x20] sm:$0xff]  ;;  %v33_v12 = vld [vmem:[%s812_s0 + $0x90] sm:$0xff]  ;;  %vm300_vm1 = vcmask 64512   ;;  %s654_s10 = smov 40  }
   0xc   :  { %v20_v13 = vld [vmem:[%s812_s0 + $0x28] sm:$0xff]  ;;  %v34_v14 = vld [vmem:[%s812_s0 + $0x98] sm:$0xff]  ;;  %v21_v15 = vld [vmem:[%s812_s0 + $0x30] sm:$0xff]  ;;  %s655_s11 = smov 32   ;;  %s656_s12 = smov 8   ;;  %v661_v50 = vmov 0.0  }
   0xd   :  { %575 = vmatmul.mubr.msk.f32.gmra.mxu0 %vm42_vm0, %v18_v9  ;;  %596 = vmatmul.mubr.msk.f32.gmra.mxu1 %vm42_vm0, %v32_v10  ;;  %v35_v16 = vld [vmem:[%s812_s0 + $0xa0] sm:$0xff]  ;;  %v22_v17 = vld [vmem:[%s812_s0 + $0x38] sm:$0xff]  ;;  %v36_v18 = vld [vmem:[%s812_s0 + $0xa8] sm:$0xff]  ;;  %s658_s13 = smov 16   ;;  %s659_s14 = smov 24   ;;  %vm662_vm2 = vmmov 0  }
   0xe   :  { %577 = vmatprep.mubr.msk.f32.mxu0 %vm42_vm0, %v19_v11  ;;  %598 = vmatprep.mubr.msk.f32.mxu1 %vm42_vm0, %v33_v12  ;;  %v23_v19 = vld [vmem:[%s812_s0 + $0x40] sm:$0xff]  ;;  %v37_v20 = vld [vmem:[%s812_s0 + $0xb0] sm:$0xff]  ;;  %v24_v21 = vld [vmem:[%s812_s0 + $0x48] sm:$0xff]  ;;  %s660_s15 = smov 56   ;;  %vm316_vm3 = vcmask 130112   ;;  %vm332_vm4 = vcmask 195712  }
   0xf   :  { %v38_v22 = vld [vmem:[%s812_s0 + $0xb8] sm:$0xff]  ;;  %v25_v23 = vld [vmem:[%s812_s0 + $0x50] sm:$0xff]  ;;  %v27_v25 = vld [vmem:[%s812_s0 + $0x60] sm:$0xff]  ;;  %607 = vmatprep.subr.mxu1 %v661_v50  ;;  %vm348_vm5 = vcmask 261312   ;;  %vm364_vm6 = vcmask 326912   ;;  %vm380_vm7 = vcmask 392512  }
  0x10   :  { %v26_v24 = vld [vmem:[%s812_s0 + $0x58] sm:$0xff]  ;;  %v28_v26 = vld [vmem:[%s812_s0 + $0x68] sm:$0xff]  ;;  %s657_s0 = smov 48   ;;  %vm396_vm8 = vcmask 458112   ;;  %vm412_vm9 = vcmask 523712   ;;  %v416_v11 = vld [vmem:[%s813_s1] sm:$0xff] }
  0x11   :  { %578 = vmatmul.mubr.msk.f32.gmra.mxu0 %vm42_vm0, %v20_v13  ;;  %599 = vmatmul.mubr.msk.f32.gmra.mxu1 %vm42_vm0, %v34_v14  ;;  %s663_s18 = smov [#allocation3]   ;;  %vm493_vm10 = vcmask 523264  }
  0x12   :  { %580 = vmatprep.mubr.msk.f32.mxu0 %vm42_vm0, %v21_v15  ;;  %601 = vmatprep.mubr.msk.f32.mxu1 %vm42_vm0, %v35_v16  ;;  %s501_s19 = sshll.u32 %s663_s18, 4  ;;  %s502_s19 = int_to_ptr.vmem [resolvable:$true] %s501_s19 }
  0x13   :  { %s632_s20 = scalar_lea.vmem %s502_s19, 128  ;;  %p637_p1 = scmp.lt.s32.totalorder %s502_s19, %s502_s19 }
  0x14   :  { %p633_p0 = scmp.ne.s32.totalorder %s502_s19, %s632_s20  ;;  %p638_p2 = scmp.lt.s32.totalorder %s632_s20, %s632_s20 }
  0x15   :  { %581 = vmatmul.mubr.msk.f32.gmra.mxu0 %vm42_vm0, %v22_v17  ;;  %602 = vmatmul.mubr.msk.f32.gmra.mxu1 %vm42_vm0, %v36_v18 }
  0x16   :  { %583 = vmatprep.mubr.msk.f32.mxu0 %vm42_vm0, %v23_v19  ;;  %604 = vmatprep.mubr.msk.f32.mxu1 %vm42_vm0, %v37_v20  ;;  %p639_p3 = por %p638_p2, %p637_p1 }
  0x18   :  { %p640_p4 = pnand %p639_p3, %p633_p0 }
  0x19   :  { %584 = vmatmul.mubr.msk.f32.gmra.mxu0 %vm42_vm0, %v24_v21  ;;  %605 = vmatmul.mubr.msk.f32.gmra.mxu1 %vm42_vm0, %v38_v22 }
  0x1a   :  { %586 = vmatprep.mubr.msk.f32.mxu0 %vm42_vm0, %v25_v23  ;;  %613 = vmatprep.mubr.msk.f32.mxu1 %vm662_vm2, %v661_v50 }
  0x1d   :  { %587 = vmatmul.mubr.msk.f32.gmra.mxu0 %vm42_vm0, %v26_v24 }
  0x1e   :  { %589 = vmatprep.mubr.msk.f32.mxu0 %vm42_vm0, %v27_v25 }
  0x21   :  { %590 = vmatmul.mubr.msk.f32.gmra.mxu0 %vm42_vm0, %v28_v26 }
  0xc9   :  { %v573_v27 = vpop.f32.mrf.mxu0  ;;  %v594_v28 = vpop.f32.mrf.mxu1 }
  0xca   :  { %302 = vst.msk [vmem:[#allocation2 + $0x8] sm:$0xff] %vm300_vm1, %v573_v27  ;;  %371 = vrot.lane.b32.xlu1 %v594_v28, %s654_s10 }
  0xcb   :  { %v181_v29 = vpop.f32.mrf.mxu0  ;;  %v251_v30 = vpop.f32.mrf.mxu1 }
  0xcc   :  { %301 = vst.msk [vmem:[#allocation2] sm:$0xff] %vm300_vm1, %v181_v29 }
  0xcd   :  { %v576_v31 = vpop.f32.mrf.mxu0  ;;  %v597_v32 = vpop.f32.mrf.mxu1 }
  0xce   :  { %359 = vrot.lane.b32.xlu1 %v251_v30, %s655_s11  ;;  %307 = vrot.lane.b32.xlu0 %v576_v31, %s656_s12 }
  0xcf   :  { %v191_v33 = vpop.f32.mrf.mxu0  ;;  %v261_v34 = vpop.f32.mrf.mxu1 }
  0xd0   :  { %303 = vst.msk [vmem:[#allocation2 + $0x10] sm:$0xff] %vm300_vm1, %v191_v33 }
  0xd1   :  { %v579_v35 = vpop.f32.mrf.mxu0  ;;  %v600_v36 = vpop.f32.mrf.mxu1 }
  0xd2   :  { %373 = vrot.lane.b32.xlu1 %v261_v34, %s654_s10  ;;  %375 = vrot.lane.b32.xlu0 %v597_v32, %s654_s10 }
  0xd3   :  { %v201_v37 = vpop.f32.mrf.mxu0  ;;  %v271_v38 = vpop.f32.mrf.mxu1 }
  0xd5   :  { %v582_v39 = vpop.f32.mrf.mxu0  ;;  %v603_v41 = vpop.f32.mrf.mxu1 }
  0xd6   :  { %311 = vrot.lane.b32.xlu0 %v579_v35, %s656_s12  ;;  %309 = vrot.lane.b32.xlu1 %v201_v37, %s656_s12 }
  0xd7   :  { %v211_v40 = vpop.f32.mrf.mxu0  ;;  %v281_v43 = vpop.f32.mrf.mxu1 }
  0xd9   :  { %v585_v42 = vpop.f32.mrf.mxu0  ;;  %v606_v48 = vpop.f32.mrf.mxu1 }
  0xda   :  { %389 = vrot.lane.b32.xlu0 %v600_v36, %s657_s0  ;;  %323 = vrot.lane.b32.xlu1 %v211_v40, %s658_s13 }
  0xdb   :  { %v221_v44 = vpop.f32.mrf.mxu0  ;;  %v291_v51 = vpop.f32.mrf.mxu1 }
  0xdd   :  { %v588_v45 = vpop.f32.mrf.mxu0 }
  0xde   :  { %325 = vrot.lane.b32.xlu0 %v582_v39, %s658_s13  ;;  %391 = vrot.lane.b32.xlu1 %v281_v43, %s657_s0 }
  0xdf   :  { %v231_v46 = vpop.f32.mrf.mxu0 }
  0xe1   :  { %v591_v47 = vpop.f32.mrf.mxu0 }
  0xe2   :  { %339 = vrot.lane.b32.xlu0 %v585_v42, %s659_s14  ;;  %343 = vrot.lane.b32.xlu1 %v588_v45, %s659_s14 }
  0xe3   :  { %v241_v49 = vpop.f32.mrf.mxu0 }
  0xe6   :  { %407 = vrot.lane.b32.xlu0 %v606_v48, %s660_s15  ;;  %341 = vrot.lane.b32.xlu1 %v231_v46, %s659_s14 }
  0xea   :  { %327 = vrot.lane.b32.xlu0 %v221_v44, %s658_s13  ;;  %355 = vrot.lane.b32.xlu1 %v241_v49, %s655_s11 }
  0xee   :  { %357 = vrot.lane.b32.xlu0 %v591_v47, %s655_s11  ;;  %387 = vrot.lane.b32.xlu1 %v271_v38, %s657_s0 }
  0xf2   :  { %405 = vrot.lane.b32.xlu0 %v291_v51, %s660_s15 }
  0xf6   :  { %403 = vrot.lane.b32.xlu0 %v603_v41, %s660_s15 }
 0x13c   :  { %v372_v52 = vpop.permute.xlu1 %371 }
 0x140   :  { %v360_v53 = vpop.permute.xlu1 %359  ;;  %v308_v54 = vpop.permute.xlu0 %307 }
 0x141   :  { %317 = vst.msk [vmem:[#allocation2] sm:$0xff] %vm316_vm3, %v308_v54 }
 0x144   :  { %v374_v55 = vpop.permute.xlu1 %373  ;;  %v376_v56 = vpop.permute.xlu0 %375 }
 0x148   :  { %v312_v57 = vpop.permute.xlu0 %311  ;;  %v310_v58 = vpop.permute.xlu1 %309 }
 0x149   :  { %319 = vst.msk [vmem:[#allocation2 + $0x10] sm:$0xff] %vm316_vm3, %v312_v57  ;;  %318 = vst.msk [vmem:[#allocation2 + $0x8] sm:$0xff] %vm316_vm3, %v310_v58 }
 0x14c   :  { %v390_v59 = vpop.permute.xlu0 %389  ;;  %v324_v60 = vpop.permute.xlu1 %323 }
 0x14d   :  { %333 = vst.msk [vmem:[#allocation2] sm:$0xff] %vm332_vm4, %v324_v60 }
 0x150   :  { %v326_v61 = vpop.permute.xlu0 %325  ;;  %v392_v62 = vpop.permute.xlu1 %391 }
 0x151   :  { %334 = vst.msk [vmem:[#allocation2 + $0x8] sm:$0xff] %vm332_vm4, %v326_v61 }
 0x154   :  { %v340_v63 = vpop.permute.xlu0 %339  ;;  %v344_v0 = vpop.permute.xlu1 %343 }
 0x155   :  { %349 = vst.msk [vmem:[#allocation2] sm:$0xff] %vm348_vm5, %v340_v63 }
 0x158   :  { %v408_v1 = vpop.permute.xlu0 %407  ;;  %v342_v2 = vpop.permute.xlu1 %341 }
 0x159   :  { %350 = vst.msk [vmem:[#allocation2 + $0x8] sm:$0xff] %vm348_vm5, %v342_v2 }
 0x15c   :  { %v328_v3 = vpop.permute.xlu0 %327  ;;  %v356_v4 = vpop.permute.xlu1 %355 }
 0x15d   :  { %335 = vst.msk [vmem:[#allocation2 + $0x10] sm:$0xff] %vm332_vm4, %v328_v3 }
 0x15e   :  { %365 = vst.msk [vmem:[#allocation2] sm:$0xff] %vm364_vm6, %v356_v4 }
 0x15f   :  { %351 = vst.msk [vmem:[#allocation2 + $0x10] sm:$0xff] %vm348_vm5, %v344_v0 }
 0x160   :  { %381 = vst.msk [vmem:[#allocation2] sm:$0xff] %vm380_vm7, %v372_v52  ;;  %v358_v5 = vpop.permute.xlu0 %357  ;;  %v388_v6 = vpop.permute.xlu1 %387 }
 0x161   :  { %367 = vst.msk [vmem:[#allocation2 + $0x10] sm:$0xff] %vm364_vm6, %v360_v53  ;;  %366 = vst.msk [vmem:[#allocation2 + $0x8] sm:$0xff] %vm364_vm6, %v358_v5 }
 0x162   :  { %383 = vst.msk [vmem:[#allocation2 + $0x10] sm:$0xff] %vm380_vm7, %v376_v56  ;;  %382 = vst.msk [vmem:[#allocation2 + $0x8] sm:$0xff] %vm380_vm7, %v374_v55 }
 0x163   :  { %399 = vst.msk [vmem:[#allocation2 + $0x10] sm:$0xff] %vm396_vm8, %v392_v62  ;;  %397 = vst.msk [vmem:[#allocation2] sm:$0xff] %vm396_vm8, %v388_v6 }
 0x164   :  { %415 = vst.msk [vmem:[#allocation2 + $0x10] sm:$0xff] %vm412_vm9, %v408_v1  ;;  %v406_v7 = vpop.permute.xlu0 %405 }
 0x165   :  { %398 = vst.msk [vmem:[#allocation2 + $0x8] sm:$0xff] %vm396_vm8, %v390_v59 }
 0x166   :  { %414 = vst.msk [vmem:[#allocation2 + $0x8] sm:$0xff] %vm412_vm9, %v406_v7 }
 0x168   :  { %v404_v8 = vpop.permute.xlu0 %403 }
 0x169   :  { %413 = vst.msk [vmem:[#allocation2] sm:$0xff] %vm412_vm9, %v404_v8 }
 0x16b   :  { %v419_v9 = vld [vmem:[#allocation2 + $0x10] sm:$0xff] }
 0x16c   :  { %608 = vmatpush3.msra.mxu1 %v419_v9 }
 0x16d   :  { %609 = vmatprep.subr.mxu1 %v661_v50  ;;  %v418_v10 = vld [vmem:[#allocation2 + $0x8] sm:$0xff] }
 0x16e   :  { %610 = vmatpush3.msra.mxu1 %v418_v10 }
 0x16f   :  { %611 = vmatprep.subr.mxu1 %v661_v50 }
 0x170   :  { %v417_v12 = vld [vmem:[#allocation2] sm:$0xff] }
 0x171   :  { %612 = vmatpush3.msra.mxu1 %v417_v12 }
 0x172   :  { %614 = vmatmul.mubr.msk.f32.vlgmr.msra.gmra.mxu1 %vm42_vm0, %v416_v11 }
 0x232   :  { %v489_v13 = vpop.f32.mrf.mxu1 }
 0x233   :  { %494 = vst.msk [vmem:[#allocation3] sm:$0xff] %vm493_vm10, %v489_v13 }
 0x234   :  { %v615_v14 = vpop.f32.mrf.mxu1 }
 0x235   :  { %643 = shalt.err (!%p640_p4)
}
 0x236   :  { %504 = dma.vmem_to_hbm [thread:$0]  %s502_s19, 128, %s815_s3, [#allocation4]  }
 0x237   :  { %652 = dma.done.wait [#allocation4], 128  }
 0x238   :  { %653 = vsyncadd [#allocation4], 4294967168 }
 0x239   :  { %508 = vsyncpa [#allocation4], 1 }

</bundles_post_ra>
